<compile_context>
chip_gen: v5e
topology: v5e:2x2
jax: 0.10.0
libtpu: 0.0.40
codegen_flags: <defaults>
</compile_context>

<pallas_src>
import jax
import jax.numpy as jnp
from jax.experimental import pallas as pl
from jax.experimental.pallas import tpu as pltpu

_NEG_SLOPE = 0.01  # PyTorch nn.LeakyReLU default negative_slope


def _cdiv(a, b):
    return (a + b - 1) // b


def _round_up(x, m):
    return ((x + m - 1) // m) * m


def _vmem_capacity_bytes():
    try:
        return int(pltpu.get_tpu_info().vmem_capacity_bytes)
    except Exception:
        return 64 << 20  # conservative fallback (v7x per-TensorCore VMEM)


def _scoring_kernel(v_ref, qp_ref, wv_ref, bv_ref, o_ref):
    # v_ref:  [1, tk, v_dim]    (one batch row, tk keys)
    # qp_ref: [1, 1, S]         (precomputed LeakyReLU(q @ Wq + bq) for this batch)
    # wv_ref: [v_dim, S], bv_ref: [1, S]   (grid-invariant)
    v = v_ref[0]  # [tk, v_dim]
    zv = jnp.dot(v, wv_ref[...], preferred_element_type=jnp.float32) + bv_ref[...]
    vp = jnp.where(zv >= 0, zv, _NEG_SLOPE * zv)          # LeakyReLU(v @ Wv + bv)
    o_ref[0] = (vp * qp_ref[0]).astype(o_ref.dtype)       # qp broadcasts over tk rows


def _pick_tk(batch, k, tk_max):
    n = _cdiv(k, tk_max)
    tk = _round_up(_cdiv(k, n), 8)
    # Ensure >= 2 grid steps when possible (v7x: two TensorCores per chip).
    if batch * _cdiv(k, tk) < 2 and k > 8:
        tk = _round_up(_cdiv(k, 2), 8)
    return tk


def scoring_function_pallas(v, q, wv, bv, wq, bq, *, tk_max=512):
    """v: [batch, k, v_dim], q: [batch, q_dim].
    wv/wq are weight_norm(dim=None)-folded and transposed to [in, S]; biases [1, S].
    Returns s = LeakyReLU(v @ Wv + bv) * LeakyReLU(q @ Wq + bq)[:, None, :],
    shape [batch, k, S] (dropout is identity in eval mode)."""
    batch, k, v_dim = v.shape
    S = wv.shape[1]

    # ---- hoisted q projection (one small matmul for the whole batch) ----
    zq = jnp.dot(q.astype(jnp.float32), wq.astype(jnp.float32)) + bq.astype(jnp.float32)
    qp = jnp.where(zq >= 0, zq, _NEG_SLOPE * zq).astype(v.dtype)     # [batch, S]
    qp3 = qp.reshape(batch, 1, S)

    # ---- tiling over k (no padding of v; Pallas handles the edge block) ----
    tk = _pick_tk(batch, k, tk_max)
    n_tiles = _cdiv(k, tk)
    grid = (batch, n_tiles)

    # ---- VMEM budget from actual block sizes, clamped below physical VMEM ----
    itemsize = jnp.dtype(v.dtype).itemsize
    blk_bytes = (tk * v_dim + S            # v tile, qp row   (double-buffered)
                 + v_dim * S + S           # Wv, bv           (grid-invariant)
                 + tk * S) * itemsize      # out tile         (double-buffered)
    cap = max(_vmem_capacity_bytes() - (8 << 20), 32 << 20)
    vmem_limit = int(min(max(2 * blk_bytes + (8 << 20), 32 << 20), min(cap, 100 << 20)))

    cost = pl.CostEstimate(
        flops=2 * batch * k * v_dim * S + 3 * batch * k * S,
        transcendentals=0,
        bytes_accessed=(batch * k * v_dim + v_dim * S + S
                        + batch * S + batch * k * S) * itemsize,
    )

    return pl.pallas_call(
        _scoring_kernel,
        out_shape=jax.ShapeDtypeStruct((batch, k, S), v.dtype),
        grid_spec=pltpu.PrefetchScalarGridSpec(
            num_scalar_prefetch=0,
            grid=grid,
            in_specs=[
                pl.BlockSpec((1, tk, v_dim), lambda b, j: (b, j, 0)),  # v tile
                pl.BlockSpec((1, 1, S), lambda b, j: (b, 0, 0)),       # qp row
                pl.BlockSpec((v_dim, S), lambda b, j: (0, 0)),         # Wv (full)
                pl.BlockSpec((1, S), lambda b, j: (0, 0)),             # bv (full)
            ],
            out_specs=pl.BlockSpec((1, tk, S), lambda b, j: (b, j, 0)),
        ),
        compiler_params=pltpu.CompilerParams(
            dimension_semantics=("parallel", "parallel"),
            vmem_limit_bytes=vmem_limit,
        ),
        cost_estimate=cost,
    )(v, qp3, wv, bv)


# ---------------- parameter construction (weight_norm folding) ----------------

def _weight_norm_fold(w_raw, g_scalar):
    """PyTorch weight_norm(dim=None): W = g * V / ||V||_F (g is a scalar)."""
    norm = jnp.sqrt(jnp.sum(w_raw.astype(jnp.float32) ** 2))
    return (g_scalar * w_raw.astype(jnp.float32) / norm).astype(w_raw.dtype)


def _init_linear(key, in_dim, out_dim, dtype=jnp.float32):
    """Synthetic init mirroring weight_norm(nn.Linear(in_dim, out_dim), dim=None)."""
    k1, k2 = jax.random.split(key)
    bound = 1.0 / (in_dim ** 0.5)
    w_raw = jax.random.uniform(k1, (out_dim, in_dim), dtype, -bound, bound)  # [out, in]
    b = jax.random.uniform(k2, (out_dim,), dtype, -bound, bound)
    g = jnp.sqrt(jnp.sum(w_raw.astype(jnp.float32) ** 2))  # weight_norm init: g = ||V||_F
    w_eff = _weight_norm_fold(w_raw, g).T                  # [in, out]
    return w_eff, b.reshape(1, out_dim)


def _reference(v, q, wv, bv, wq, bq):
    vp = jax.nn.leaky_relu(v @ wv + bv, _NEG_SLOPE)                 # [batch, k, S]
    qp = jax.nn.leaky_relu(q @ wq + bq, _NEG_SLOPE)                 # [batch, S]
    return vp * qp[:, None, :]


if __name__ == "__main__":
    # Small shapes consistent with the module (scaled-down defaults).
    batch, k = 2, 8
    ques_dim, v_dim, score_dim = 16, 32, 32

    key = jax.random.PRNGKey(0)
    kv, kq, kpv, kpq = jax.random.split(key, 4)
    v = jax.random.normal(kv, (batch, k, v_dim), jnp.float32)
    q = jax.random.normal(kq, (batch, ques_dim), jnp.float32)

    wv, bv = _init_linear(kpv, v_dim, score_dim)      # v_proj: FCNet([v_dim, score_dim])
    wq, bq = _init_linear(kpq, ques_dim, score_dim)   # q_proj: FCNet([q_dim, score_dim])

    out = scoring_function_pallas(v, q, wv, bv, wq, bq)
    out = jax.block_until_ready(out)

    ref = _reference(v, q, wv, bv, wq, bq)
    assert out.shape == (batch, k, score_dim)
    assert jnp.allclose(out, ref, atol=1e-5, rtol=1e-5), "mismatch vs reference"

    print("KERNEL_OK")
</pallas_src>

<mosaic_0001>
module attributes {stable_mosaic.version = 11 : i64} {
  func.func @_scoring_kernel(%arg0: i32, %arg1: i32, %arg2: memref<1x8x32xf32, #tpu.memory_space<vmem>>, %arg3: memref<1x1x32xf32, #tpu.memory_space<vmem>>, %arg4: memref<32x32xf32, #tpu.memory_space<vmem>>, %arg5: memref<1x32xf32, #tpu.memory_space<vmem>>, %arg6: memref<1x8x32xf32, #tpu.memory_space<vmem>>) attributes {dimension_semantics = [#tpu.dimension_semantics<parallel>, #tpu.dimension_semantics<parallel>], iteration_bounds = array<i64: 2, 1>, scalar_prefetch = 0 : i64, scratch_operands = 0 : i64, tpu.core_type = #tpu.core_type<tc>, window_params = [{transform_indices = @transform_0, window_bounds = array<i64: 1, 8, 32>}, {transform_indices = @transform_1, window_bounds = array<i64: 1, 1, 32>}, {pipeline_mode = #tpu.pipeline_mode<synchronous>, transform_indices = @transform_2, window_bounds = array<i64: 32, 32>}, {pipeline_mode = #tpu.pipeline_mode<synchronous>, transform_indices = @transform_3, window_bounds = array<i64: 1, 32>}, {transform_indices = @transform_4, window_bounds = array<i64: 1, 8, 32>}]} {
    %c0 = arith.constant 0 : index
    %c0_0 = arith.constant 0 : index
    %c0_1 = arith.constant 0 : index
    %0 = vector.load %arg2[%c0, %c0_0, %c0_1] : memref<1x8x32xf32, #tpu.memory_space<vmem>>, vector<1x8x32xf32>
    %1 = vector.shape_cast %0 : vector<1x8x32xf32> to vector<8x32xf32>
    %c0_2 = arith.constant 0 : index
    %c0_3 = arith.constant 0 : index
    %2 = vector.load %arg4[%c0_2, %c0_3] : memref<32x32xf32, #tpu.memory_space<vmem>>, vector<32x32xf32>
    %cst = arith.constant dense<0.000000e+00> : vector<8x32xf32>
    %3 = tpu.matmul %1, %2, %cst {dimension_numbers = #tpu.dot_dimension_numbers<[1], [0], [0], [1], [0, 0, 1, 1], [], []>} : vector<8x32xf32>, vector<32x32xf32>, vector<8x32xf32> -> vector<8x32xf32>
    %c0_4 = arith.constant 0 : index
    %c0_5 = arith.constant 0 : index
    %4 = vector.load %arg5[%c0_4, %c0_5] : memref<1x32xf32, #tpu.memory_space<vmem>>, vector<1x32xf32>
    %5 = vector.broadcast %4 : vector<1x32xf32> to vector<8x32xf32>
    %6 = arith.addf %3, %5 : vector<8x32xf32>
    %cst_6 = arith.constant 0.000000e+00 : f32
    %7 = vector.broadcast %cst_6 : f32 to vector<8x32xf32>
    %8 = arith.cmpf oge, %6, %7 : vector<8x32xf32>
    %cst_7 = arith.constant 0.00999999977 : f32
    %9 = vector.broadcast %cst_7 : f32 to vector<8x32xf32>
    %10 = arith.mulf %9, %6 : vector<8x32xf32>
    %11 = arith.select %8, %6, %10 : vector<8x32xi1>, vector<8x32xf32>
    %c0_8 = arith.constant 0 : index
    %c0_9 = arith.constant 0 : index
    %c0_10 = arith.constant 0 : index
    %12 = vector.load %arg3[%c0_8, %c0_9, %c0_10] : memref<1x1x32xf32, #tpu.memory_space<vmem>>, vector<1x1x32xf32>
    %13 = vector.shape_cast %12 : vector<1x1x32xf32> to vector<1x32xf32>
    %14 = vector.broadcast %13 : vector<1x32xf32> to vector<8x32xf32>
    %15 = arith.mulf %11, %14 : vector<8x32xf32>
    %c0_11 = arith.constant 0 : index
    %c0_12 = arith.constant 0 : index
    %c0_13 = arith.constant 0 : index
    %16 = vector.load %arg6[%c0_11, %c0_12, %c0_13] : memref<1x8x32xf32, #tpu.memory_space<vmem>>, vector<1x8x32xf32>
    %17 = vector.shape_cast %16 : vector<1x8x32xf32> to vector<8x32xf32>
    %18 = vector.shape_cast %15 : vector<8x32xf32> to vector<1x8x32xf32>
    tpu.vector_store %arg6[%c0_11, %c0_12, %c0_13], %18 {strides = array<i32>} : memref<1x8x32xf32, #tpu.memory_space<vmem>>, vector<1x8x32xf32>,
    return
  }
  func.func @transform_0(%arg0: i32, %arg1: i32) -> (i32, i32, i32) {
    %c0_i32 = arith.constant 0 : i32
    %c0_i32_0 = arith.constant 0 : i32
    return %arg0, %arg1, %c0_i32 : i32, i32, i32
  }
  func.func @transform_1(%arg0: i32, %arg1: i32) -> (i32, i32, i32) {
    %c0_i32 = arith.constant 0 : i32
    %c0_i32_0 = arith.constant 0 : i32
    %c0_i32_1 = arith.constant 0 : i32
    return %arg0, %c0_i32, %c0_i32_0 : i32, i32, i32
  }
  func.func @transform_2(%arg0: i32, %arg1: i32) -> (i32, i32) {
    %c0_i32 = arith.constant 0 : i32
    %c0_i32_0 = arith.constant 0 : i32
    %c0_i32_1 = arith.constant 0 : i32
    return %c0_i32, %c0_i32_0 : i32, i32
  }
  func.func @transform_3(%arg0: i32, %arg1: i32) -> (i32, i32) {
    %c0_i32 = arith.constant 0 : i32
    %c0_i32_0 = arith.constant 0 : i32
    %c0_i32_1 = arith.constant 0 : i32
    return %c0_i32, %c0_i32_0 : i32, i32
  }
  func.func @transform_4(%arg0: i32, %arg1: i32) -> (i32, i32, i32) {
    %c0_i32 = arith.constant 0 : i32
    %c0_i32_0 = arith.constant 0 : i32
    return %arg0, %arg1, %c0_i32 : i32, i32, i32
  }
}

</mosaic_0001>

<bundles_post_ra>
// kernel: tpu_custom_call.1
= control target key start
LH: loop header
LB: loop body
LE: loop exit
PB: predicated region body
PF: predicated region fallthrough
CT: control target
= control target key end

     0   :  { %s921_s0 = inlined_call_operand.hbm [shape: f32[2,8,32], index: 0, kind: input, shape index: {}]   ;;  %s922_s1 = inlined_call_operand.hbm [shape: f32[2,1,32], index: 1, kind: input, shape index: {}]   ;;  %s923_s2 = inlined_call_operand.hbm [shape: f32[32,32], index: 2, kind: input, shape index: {}]   ;;  %s924_s3 = inlined_call_operand.vmem [shape: f32[1,32], index: 3, kind: input, shape index: {}]   ;;  %s925_s4 = inlined_call_operand.hbm [shape: f32[2,8,32], index: 4, kind: output, shape index: {}]  }
   0x1   :  { %929 = sst [smem:[#allocation17_spill]] %s923_s2 }
   0x2   :  { %9 = vsyncpa [#allocation3], 0 }
   0x3   :  { %11 = vsyncpa [#allocation3 + $0x1], 0 }
   0x4   :  { %12 = vsyncpa [#allocation6], 0 }
   0x5   :  { %14 = vsyncpa [#allocation6 + $0x1], 0 }
   0x6   :  { %15 = vsyncpa [#allocation4], 0 }
   0x7   :  { %17 = vsyncpa [#allocation4 + $0x1], 0  ;;  %s758_s15 = smov 0   ;;  %s760_s16 = smov 0  }
   0x8   :  { %s762_s17 = smov 0   ;;  %s764_s18 = smov 0  }
   0x9   :  { %s766_s19 = smov 0   ;;  %s768_s20 = smov 0  }
   0xa LB: > { %930 = sst [smem:[#allocation13_spill]] %s716_s17  ;;  %s789_s21 = sadd.s32 4294967295, %s728_s20   ;;  %s728_s20 = sphi %s768_s20, %s23_s20   ;;  %s724_s19 = sphi %s766_s19, %s947_s19   ;;  %s720_s18 = sphi %s764_s18, %s946_s18   ;;  %s716_s17 = sphi %s762_s17, %s942_s17   ;;  %s712_s16 = sphi %s760_s16, %s945_s16   ;;  %s708_s15 = sphi %s758_s15, %s944_s15  }
   0xb   : > { %p452_p0 = scmp.ge.s32.totalorder %s728_s20, 1  ;;  %p58_p1 = scmp.eq.s32.totalorder %s789_s21, 0 }
   0xc   : > { %p164_p2 = scmp.lt.s32.totalorder %s728_s20, 3  ;;  %s931_s2 = sld [smem:[#allocation17_spill]] }
   0xd   : > { %s730_s26 = smov [#allocation7]   ;;  %p454_p6 = scmp.ge.s32.totalorder %s728_s20, 2 }
   0xe   : > { %p797_p3 = pnand %p452_p0, %p164_p2  ;;  %s177_s27 = sshll.u32 %s730_s26, 4  ;;  %s178_s27 = int_to_ptr.vmem [resolvable:$true] %s177_s27 }
   0xf   : > { %s731_s28 = smov 128   ;;  %s732_s29 = smov 8  }
  0x10   : > { %p476_p4 = pneg %p797_p3  ;;  %s451_s30 = sadd.s32 4294967294, %s728_s20  }
  0x11   : > { %s35_s5 = sadd.s32 1, %s724_s19  ;;  %s44_s6 = sadd.s32 1, %s716_s17 }
  0x12   : > { %s175_s24 = sshll.u32 %s931_s2, 4  ;;  %p477_p5 = pnand %p476_p4, %p58_p1  ;;  %s176_s24 = int_to_ptr.hbm [resolvable:$true] %s175_s24 }
  0x13   : > { %p37_p7 = scmp.ge.s32.totalorder %s35_s5, 2  ;;  %p51_p8 = scmp.ne.s32.totalorder %s716_s17, %s712_s16 }
  0x14   : > { %479 = dma.hbm_to_vmem [thread:$0]  (!%p477_p5), %s176_s24, 512, %s178_s27, [#allocation6], %s731_s28, %s731_s28, %s732_s29  }
  0x15   : > { %p52_p9 = scmp.eq.s32.totalorder %s728_s20, 0  ;;  %p57_p10 = scmp.ne.s32.totalorder %s712_s16, %s708_s15 }
  0x16   : > { %s949_s5 = smov (%p37_p7, %s35_s5), 0  ;;  %p151_p13 = scmp.eq.s32.totalorder %s789_s21, 1 }
  0x17   : > { %933 = sst [smem:[#allocation14_spill]] %s949_s5  ;;  %p816_p11 = por %p52_p9, %p51_p8 }
  0x18   : > { %p822_p12 = por %p58_p1, %p57_p10  ;;  %s39_s9 = ssub.s32 %s724_s19, %s949_s5 }
  0x19   : > { %p42_p0 = scmp.eq.s32.totalorder %s39_s9, 0  ;;  %p157_p2 = scmp.eq.s32.totalorder %s451_s30, 1 }
  0x1a   : > { %p829_p4 = por %p151_p13, %p51_p8  ;;  %p492_p5 = scmp.lt.s32.totalorder %s728_s20, 2 }
  0x1b   : > { %s835_s11 = scalar_select %p42_p0, %s716_s17, %s44_s6  }
  0x1c   : > { %p837_p7 = por %p157_p2, %p57_p10  ;;  %s194_s13 = sand.u32 1, %s716_s17  }
  0x1d   : > { %937 = sst [smem:[#allocation15_spill]] %s835_s11  ;;  %s455_s14 = sshll.u32 %s194_s13, 3 }
  0x1e   : > { %s938_s12 = scalar_select %p837_p7, 1, 0 }
  0x1f   : > { %s456_s22 = sshll.u32 %s724_s19, 3  ;;  %s198_s27 = scalar_lea.vmem [#allocation2], %s455_s14 }
  0x20   : > { %939 = sst [smem:[#allocation16_spill]] %s938_s12  ;;  %s203_s26 = scalar_lea.hbm %s921_s0, %s456_s22 }
  0x21   : > { %s207_s28 = sshll.u32 %s198_s27, 4  ;;  %s205_s29 = sshll.u32 %s203_s26, 4  ;;  %s208_s28 = int_to_ptr.vmem [resolvable:$true] %s207_s28  ;;  %s206_s29 = int_to_ptr.hbm [resolvable:$true] %s205_s29 }
  0x22   : > { %p481_p8 = pnand %p492_p5, %p816_p11  ;;  %s214_s30 = sand.u32 1, %s728_s20  }
  0x23   : > { %s195_s6 = scalar_lea.sflag [#allocation3], %s194_s13  ;;  %s220_s5 = scalar_lea.hbm %s922_s1, %s724_s19 }
  0x24   : > { %483 = dma.hbm_to_vmem [thread:$0]  (!%p481_p8), %s206_s29, 128, %s208_s28, %s195_s6  }
  0x25   : > { %s217_s11 = scalar_lea.vmem [#allocation5], %s194_s13  ;;  %s222_s12 = sshll.u32 %s220_s5, 4  ;;  %s223_s12 = int_to_ptr.hbm [resolvable:$true] %s222_s12 }
  0x26   : > { %s224_s17 = sshll.u32 %s217_s11, 4  ;;  %s215_s22 = scalar_lea.sflag [#allocation6], %s214_s30  ;;  %s225_s17 = int_to_ptr.vmem [resolvable:$true] %s224_s17 }
  0x27   : > { %486 = dma.hbm_to_vmem [thread:$0]  (!%p481_p8), %s223_s12, 16, %s225_s17, %s215_s22  }
  0x28   : > { %233 = sbr.rel (%p797_p3) target bundleno = 195 (0xc3), region = 36  ;;  %s856_s7 = sand.u32 (!%p797_p3), 1, %s712_s16  }
  0x29   : > { %s458_s14 = sshll.u32 (!%p797_p3), %s856_s7, 3  ;;  %s236_s2 = scalar_lea.sflag (!%p797_p3), [#allocation3], %s856_s7 }
  0x2a   : > { %s239_s13 = scalar_lea.vmem (!%p797_p3), [#allocation2], %s458_s14 }
  0x2d   : > { %691 = dma.done.wait (%p822_p12), %s236_s2, 128  }
  0x2e   : > { %693 = vsyncadd (%p822_p12), %s236_s2, 4294967168  ;;  %s245_s17 = sand.u32 1, %s789_s21   ;;  %s248_s5 = scalar_lea.vmem [#allocation5], %s856_s7 }
  0x2f   : > { %s246_s25 = scalar_lea.sflag [#allocation6], %s245_s17 }
  0x30   : > { %695 = dma.done.wait (%p822_p12), %s246_s25, 16  }
  0x31   : > { %697 = vsyncadd (%p822_p12), %s246_s25, 4294967280 }
  0x32   : > { %699 = dma.done.wait (%p58_p1), [#allocation6], 512  }
  0x33   : > { %701 = vsyncadd (%p58_p1), [#allocation6], 4294966784  ;;  %v287_v0 = vld [vmem:[#allocation7 + $0x18] sm:$0xff]  ;;  %v286_v1 = vld [vmem:[#allocation7 + $0x10] sm:$0xff]  ;;  %vm292_vm0 = vcmask 261120   ;;  %s463_s21 = sshll.u32 %s720_s18, 3 }
  0x34   : > { %308 = vmatpush.msra.mxu0 %v287_v0  ;;  %v285_v2 = vld [vmem:[#allocation7 + $0x8] sm:$0xff]  ;;  %v284_v3 = vld [vmem:[#allocation7] sm:$0xff]  ;;  %s337_s24 = scalar_lea.hbm %s925_s4, %s463_s21  ;;  %s282_s26 = scalar_lea.vmem [#allocation8], %s458_s14 }
  0x35   : > { %v283_v4 = vld [vmem:[%s239_s13] sm:$0xff]  ;;  %s339_s27 = sshll.u32 %s282_s26, 4  ;;  %s341_s28 = sshll.u32 %s337_s24, 4  ;;  %s340_s27 = int_to_ptr.vmem [resolvable:$true] %s339_s27  ;;  %s342_s28 = int_to_ptr.hbm [resolvable:$true] %s341_s28 }
  0x36   : > { %309 = vmatpush.msra.mxu0 %v286_v1  ;;  %v546_v5 = vld [vmem:[%s924_s3] ss:$0 sm:$0xff]  ;;  %s326_s18 = scalar_lea.sflag [#allocation4], %s856_s7  ;;  %s652_s29 = sshra.s32 %s342_s28, 4  ;;  %s653_s29 = int_to_ptr.hbm [resolvable:$true] %s652_s29 }
  0x37   : > { %v547_v8 = vld [vmem:[%s248_s5] ss:$0 sm:$0xff]  ;;  %s654_s30 = scalar_lea.hbm %s653_s29, 8  ;;  %s658_s22 = scalar_lea.hbm %s925_s4, 16 }
  0x38   : > { %310 = vmatpush.msra.mxu0 %v285_v2  ;;  %p655_p1 = scmp.ne.s32.totalorder %s653_s29, %s654_s30  ;;  %p659_p10 = scmp.lt.s32.totalorder %s653_s29, %s925_s4 }
  0x39   : > { %p660_p11 = scmp.lt.s32.totalorder %s658_s22, %s654_s30 }
  0x3a   : > { %311 = vmatpush.msra.mxu0 %v284_v3  ;;  %p656_p3 = pnand %p655_p1, %p829_p4 }
  0x3b   : > { %461 = vmatmul.msk.f32.vlgmr.msra.gmra.mxu0 %vm292_vm0, %v283_v4  ;;  %p661_p12 = por %p660_p11, %p659_p10 }
  0x3c   : > { %p657_p9 = pneg %p656_p3 }
  0x3e   : > { %p662_p13 = pnand %p661_p12, %p657_p9 }
  0xb8   : > { %v313_v6 = vpop.f32.mrf.mxu0 }
  0xb9   : > { %v314_v7 = vadd.f32 %v546_v5, %v313_v6 }
  0xbb   : > { %vm316_vm1 = vcmp.ge.f32.partialorder %v314_v7, 0.0  ;;  %v317_v9 = vmul.f32 0.01, %v314_v7 }
  0xbd   : > { %v318_v10 = vsel %vm316_vm1, %v314_v7, %v317_v9 }
  0xbe   : > { %v323_v11 = vmul.f32 %v547_v8, %v318_v10 }
  0xc0   : > { %324 = vst.msk [vmem:[%s282_s26] sm:$0xff] %vm292_vm0, %v323_v11 }
  0xc1   : > { %665 = shalt.err (!%p662_p13)
}
  0xc2   : > { %474 = dma.vmem_to_hbm [thread:$0]  (%p829_p4), %s340_s27, 128, %s342_s28, %s326_s18  }
  0xc3 PF: > { %s353_s13 = sand.u32 1, %s708_s15   ;;  %p488_p0 = pnand %p454_p6, %p837_p7 }
  0xc4   : > { %s354_s17 = scalar_lea.sflag [#allocation4], %s353_s13 }
  0xc5   : > { %p489_p2 = pneg %p488_p0 }
  0xc7   : > { %703 = dma.done.wait (%p489_p2), %s354_s17, 128  }
  0xc8   : > { %705 = vsyncadd (%p489_p2), %s354_s17, 4294967168  ;;  %s23_s20 = sadd.s32 1, %s728_s20   ;;  %s941_s25 = sld [smem:[#allocation13_spill]] }
  0xc9   : > { %p20_p5 = scmp.ge.s32.totalorder %s23_s20, 4   ;;  %s942_s17 = sld [smem:[#allocation15_spill]] }
  0xca   : > { %s943_s10 = sld [smem:[#allocation14_spill]]  ;;  %s944_s15 = smov %s712_s16 }
  0xcb   : > { %s946_s18 = smov %s724_s19 }
  0xcc   :  { %22 = sbr.rel (!%p20_p5) target bundleno = 10 (0xa), region = 98 }
  0xce   : > { %s945_s16 = smov %s941_s25 }
  0xd0   : > { %s947_s19 = smov %s943_s10 }
  0xd1   :  { %360 = vsyncpa [#allocation3], 1 }
  0xd2   :  { %362 = vsyncpa [#allocation3 + $0x1], 1 }
  0xd3   :  { %363 = vsyncpa [#allocation6], 1 }
  0xd4   :  { %365 = vsyncpa [#allocation6 + $0x1], 1 }
  0xd5   :  { %366 = vsyncpa [#allocation4], 1 }
  0xd6   :  { %368 = vsyncpa [#allocation4 + $0x1], 1 }

</bundles_post_ra>
